<compile_context>
chip_gen: v6e
topology: v6e:2x2x1
jax: 0.10.0
libtpu: 0.0.40
codegen_flags: <defaults>
</compile_context>

<pallas_src>
import functools

import jax
import jax.numpy as jnp
from jax.experimental import pallas as pl
from jax.experimental.pallas import tpu as pltpu


# ----------------------------------------------------------------------------
# Pallas kernel
# ----------------------------------------------------------------------------
def _spatial_transformer_kernel(grid_ref, flow_ref, x_ref, o_ref, *, h, w, c_pad):
    """One (batch, output-pixel-tile) step of separable bilinear grid_sample.

    grid_ref : (2, TP)          base sampling grid (row, col) for this pixel tile
    flow_ref : (1, 2, TP)       flow (row-offset, col-offset) for this batch/tile
    x_ref    : (1, C_pad*H, W)  input image, rows = (channel, image-row)
    o_ref    : (1, C_pad, TP)   warped output pixels
    """
    base = grid_ref[...]                         # (2, TP)
    flw = flow_ref[0]                            # (2, TP)
    row_pix = base[0:1, :] + flw[0:1, :]         # (1, TP) new_locs, row coordinate
    col_pix = base[1:2, :] + flw[1:2, :]         # (1, TP) new_locs, col coordinate

    # normalize to [-1, 1] (module) then un-normalize (grid_sample, align_corners
    # =True).  The round trip is an fp no-op kept for bit-level fidelity with
    # PyTorch; for h == 1 or w == 1 it divides by zero exactly like the module.
    row = ((2.0 * (row_pix / (h - 1) - 0.5)) + 1.0) * 0.5 * (h - 1)
    col = ((2.0 * (col_pix / (w - 1) - 0.5)) + 1.0) * 0.5 * (w - 1)

    y0f = jnp.floor(row)
    x0f = jnp.floor(col)
    wy = row - y0f                               # fractional weights (1, TP)
    wx = col - x0f
    y0 = y0f.astype(jnp.int32)
    x0 = x0f.astype(jnp.int32)

    tp = base.shape[-1]

    # Per-axis interpolation matrices, each a single fused expression (one VMEM
    # write pass).  'zeros' padding: OOB indices never match the iota; the
    # explicit masks keep that invariant even if the expression is refactored.
    x_iota = jax.lax.broadcasted_iota(jnp.int32, (w, tp), 0)
    vx0 = (x0 >= 0) & (x0 < w)
    vx1 = (x0 + 1 >= 0) & (x0 + 1 < w)
    bx = (jnp.where((x_iota == x0) & vx0, 1.0 - wx, 0.0)
          + jnp.where((x_iota == x0 + 1) & vx1, wx, 0.0))        # (W, TP)

    y_iota = jax.lax.broadcasted_iota(jnp.int32, (h, tp), 0)
    vy0 = (y0 >= 0) & (y0 < h)
    vy1 = (y0 + 1 >= 0) & (y0 + 1 < h)
    ay = (jnp.where((y_iota == y0) & vy0, 1.0 - wy, 0.0)
          + jnp.where((y_iota == y0 + 1) & vy1, wy, 0.0))        # (H, TP)

    # Stage 1 (MXU): contract the image-column axis.
    #   (C_pad*H, W) @ (W, TP) -> (C_pad*H, TP)
    tmp = jnp.dot(x_ref[0], bx, preferred_element_type=jnp.float32)

    # Stage 2 (VPU): per-lane combine over the H image rows, one channel at a
    # time (small static unroll of 2-D slice / multiply / sublane-reduce ops),
    # assembled into a single (C_pad, TP) store.
    rows = []
    for ci in range(c_pad):
        blk = tmp[ci * h:(ci + 1) * h, :]                        # (H, TP)
        rows.append(jnp.sum(blk * ay, axis=0, keepdims=True))    # (1, TP)
    o_ref[0] = jnp.concatenate(rows, axis=0)                     # single store pass


# ----------------------------------------------------------------------------
# Wrapper
# ----------------------------------------------------------------------------
def _choose_pixel_tile(p, n):
    """Output-pixel tile: multiple of 128 lanes, capped at 512, and split so the
    parallel grid has at least two steps when batch == 1 (keeps both v7x TCs busy)."""
    p128 = pl.cdiv(p, 128) * 128
    tp = min(512, p128)
    if n * pl.cdiv(p128, tp) < 2 and p128 >= 256:
        tp = pl.cdiv(p128 // 2, 128) * 128
    return tp


def spatial_transformer_forward(x, flow, *, mode="bilinear"):
    """x: (N, C, H, W), flow: (N, 2, H, W) -> warped (N, C, H, W)."""
    assert mode == "bilinear", "TODO(synk): only bilinear grid_sample implemented"
    n, c, h, w = x.shape
    assert flow.shape == (n, 2, h, w)
    p = h * w

    tp = _choose_pixel_tile(p, n)
    n_tiles = pl.cdiv(p, tp)
    p_pad = n_tiles * tp                       # lane-dense, multiple of tp
    c_pad = pl.cdiv(c, 8) * 8                  # full sublanes for the output block

    # self.grid buffer: meshgrid(arange(H), arange(W), indexing='ij'), flattened.
    gy, gx = jnp.meshgrid(jnp.arange(h, dtype=jnp.float32),
                          jnp.arange(w, dtype=jnp.float32), indexing="ij")
    base_grid = jnp.pad(jnp.stack([gy, gx], axis=0).reshape(2, p),
                        ((0, 0), (0, p_pad - p)))

    flow_flat = jnp.pad(flow.reshape(n, 2, p).astype(jnp.float32),
                        ((0, 0), (0, 0), (0, p_pad - p)))

    # Channel-padded image laid out as (channel*row, column) so the kernel can
    # contract the column axis on the MXU with M = C_pad*H.
    x_rows = jnp.pad(x.astype(jnp.float32),
                     ((0, 0), (0, c_pad - c), (0, 0), (0, 0))
                     ).reshape(n, c_pad * h, w)

    # VMEM budget per grid step (double-buffered blocks + kernel temporaries),
    # capped so the same tiling also fits v7x's 64 MiB physical VMEM.
    step_bytes = 4 * (2 * c_pad * h * w          # x block
                      + 2 * (2 * tp) * 2         # base grid + flow blocks
                      + 2 * c_pad * tp           # output block
                      + 3 * c_pad * h * tp       # matmul result + combine temps
                      + 6 * (h + w) * tp)        # Ay / Bx / iotas / masks
    vmem_limit = int(min(max(2 * step_bytes, 32 * 1024 * 1024), 48 * 1024 * 1024))

    # x is DMA'd once per batch (its block index is constant over the tile axis).
    flops = int(n * (2 * (c_pad * h) * w * p_pad     # stage-1 MXU matmul
                     + 2 * c_pad * h * p_pad         # stage-2 per-lane combine
                     + 16 * (h + w) * p_pad))        # Ay/Bx construction (VPU)
    bytes_accessed = int(4 * (n * c_pad * h * w      # x, once per batch
                              + n * 2 * p_pad        # flow
                              + n * 2 * p_pad        # base grid (re-read per batch)
                              + n * c_pad * p_pad))  # output

    out = pl.pallas_call(
        functools.partial(_spatial_transformer_kernel, h=h, w=w, c_pad=c_pad),
        out_shape=jax.ShapeDtypeStruct((n, c_pad, p_pad), jnp.float32),
        grid_spec=pltpu.PrefetchScalarGridSpec(
            num_scalar_prefetch=0,
            grid=(n, n_tiles),
            in_specs=[
                pl.BlockSpec((2, tp), lambda b, t: (0, t)),               # base grid
                pl.BlockSpec((1, 2, tp), lambda b, t: (b, 0, t)),         # flow
                pl.BlockSpec((1, c_pad * h, w), lambda b, t: (b, 0, 0)),  # image
            ],
            out_specs=pl.BlockSpec((1, c_pad, tp), lambda b, t: (b, 0, t)),
        ),
        compiler_params=pltpu.CompilerParams(
            dimension_semantics=("parallel", "parallel"),
            vmem_limit_bytes=vmem_limit),
        cost_estimate=pl.CostEstimate(flops=flops, transcendentals=0,
                                      bytes_accessed=bytes_accessed),
    )(base_grid, flow_flat, x_rows)

    return out[:, :c, :p].reshape(n, c, h, w)


# ----------------------------------------------------------------------------
# Pure-JAX reference (same math, XLA gather) for a correctness check
# ----------------------------------------------------------------------------
def _reference_forward(x, flow):
    n, c, h, w = x.shape
    gy, gx = jnp.meshgrid(jnp.arange(h, dtype=jnp.float32),
                          jnp.arange(w, dtype=jnp.float32), indexing="ij")
    row = gy[None] + flow[:, 0]
    col = gx[None] + flow[:, 1]
    row = ((2.0 * (row / (h - 1) - 0.5)) + 1.0) * 0.5 * (h - 1)
    col = ((2.0 * (col / (w - 1) - 0.5)) + 1.0) * 0.5 * (w - 1)
    y0 = jnp.floor(row)
    x0 = jnp.floor(col)
    wy = row - y0
    wx = col - x0
    x_flat = x.reshape(n, c, h * w)

    def corner(yi, xi, wt):
        valid = (yi >= 0) & (yi < h) & (xi >= 0) & (xi < w)
        yc = jnp.clip(yi, 0, h - 1).astype(jnp.int32)
        xc = jnp.clip(xi, 0, w - 1).astype(jnp.int32)
        idx = (yc * w + xc).reshape(n, 1, h * w)
        vals = jnp.take_along_axis(
            x_flat, jnp.broadcast_to(idx, (n, c, h * w)), axis=2)
        wt = jnp.where(valid, wt, 0.0).reshape(n, 1, h * w)
        return vals * wt

    out = (corner(y0, x0, (1.0 - wy) * (1.0 - wx))
           + corner(y0, x0 + 1.0, (1.0 - wy) * wx)
           + corner(y0 + 1.0, x0, wy * (1.0 - wx))
           + corner(y0 + 1.0, x0 + 1.0, wy * wx))
    return out.reshape(n, c, h, w)


# ----------------------------------------------------------------------------
if __name__ == "__main__":
    key = jax.random.PRNGKey(0)
    kx, kf = jax.random.split(key)

    N, C, H, W = 2, 4, 16, 16
    x = jax.random.normal(kx, (N, C, H, W), jnp.float32)
    # flow in pixels; amplitude 3 exercises both in-bounds and zeros-padded samples
    flow = 3.0 * jax.random.normal(kf, (N, 2, H, W), jnp.float32)

    fwd = jax.jit(spatial_transformer_forward)
    out = jax.block_until_ready(fwd(x, flow))

    assert out.shape == (N, C, H, W), out.shape
    assert out.dtype == jnp.float32
    assert bool(jnp.all(jnp.isfinite(out)))

    ref = _reference_forward(x, flow)
    max_err = float(jnp.max(jnp.abs(out - ref)))
    assert max_err < 1e-2, f"mismatch vs reference: {max_err}"

    print("KERNEL_OK")
</pallas_src>

<mosaic_0001>
module attributes {stable_mosaic.version = 11 : i64} {
  func.func @_spatial_transformer_kernel(%arg0: i32, %arg1: i32, %arg2: memref<2x256xf32, #tpu.memory_space<vmem>>, %arg3: memref<1x2x256xf32, #tpu.memory_space<vmem>>, %arg4: memref<1x128x16xf32, #tpu.memory_space<vmem>>, %arg5: memref<1x8x256xf32, #tpu.memory_space<vmem>>) attributes {dimension_semantics = [#tpu.dimension_semantics<parallel>, #tpu.dimension_semantics<parallel>], iteration_bounds = array<i64: 2, 1>, scalar_prefetch = 0 : i64, scratch_operands = 0 : i64, tpu.core_type = #tpu.core_type<tc>, window_params = [{transform_indices = @transform_0, window_bounds = array<i64: 2, 256>}, {transform_indices = @transform_1, window_bounds = array<i64: 1, 2, 256>}, {transform_indices = @transform_2, window_bounds = array<i64: 1, 128, 16>}, {transform_indices = @transform_3, window_bounds = array<i64: 1, 8, 256>}]} {
    %c0 = arith.constant 0 : index
    %c0_0 = arith.constant 0 : index
    %0 = vector.load %arg2[%c0, %c0_0] : memref<2x256xf32, #tpu.memory_space<vmem>>, vector<2x256xf32>
    %c0_1 = arith.constant 0 : index
    %c0_2 = arith.constant 0 : index
    %c0_3 = arith.constant 0 : index
    %1 = vector.load %arg3[%c0_1, %c0_2, %c0_3] : memref<1x2x256xf32, #tpu.memory_space<vmem>>, vector<1x2x256xf32>
    %2 = vector.shape_cast %1 : vector<1x2x256xf32> to vector<2x256xf32>
    %3 = vector.extract_strided_slice %0 {offsets = [0, 0], sizes = [1, 256], strides = [1, 1]} : vector<2x256xf32> to vector<1x256xf32>
    %4 = vector.extract_strided_slice %2 {offsets = [0, 0], sizes = [1, 256], strides = [1, 1]} : vector<2x256xf32> to vector<1x256xf32>
    %5 = arith.addf %3, %4 : vector<1x256xf32>
    %6 = vector.extract_strided_slice %0 {offsets = [1, 0], sizes = [1, 256], strides = [1, 1]} : vector<2x256xf32> to vector<1x256xf32>
    %7 = vector.extract_strided_slice %2 {offsets = [1, 0], sizes = [1, 256], strides = [1, 1]} : vector<2x256xf32> to vector<1x256xf32>
    %8 = arith.addf %6, %7 : vector<1x256xf32>
    %cst = arith.constant 1.500000e+01 : f32
    %9 = vector.broadcast %cst : f32 to vector<1x256xf32>
    %10 = arith.divf %5, %9 : vector<1x256xf32>
    %cst_4 = arith.constant 5.000000e-01 : f32
    %11 = vector.broadcast %cst_4 : f32 to vector<1x256xf32>
    %12 = arith.subf %10, %11 : vector<1x256xf32>
    %cst_5 = arith.constant 2.000000e+00 : f32
    %13 = vector.broadcast %cst_5 : f32 to vector<1x256xf32>
    %14 = arith.mulf %13, %12 : vector<1x256xf32>
    %cst_6 = arith.constant 1.000000e+00 : f32
    %15 = vector.broadcast %cst_6 : f32 to vector<1x256xf32>
    %16 = arith.addf %14, %15 : vector<1x256xf32>
    %cst_7 = arith.constant 5.000000e-01 : f32
    %17 = vector.broadcast %cst_7 : f32 to vector<1x256xf32>
    %18 = arith.mulf %16, %17 : vector<1x256xf32>
    %cst_8 = arith.constant 1.500000e+01 : f32
    %19 = vector.broadcast %cst_8 : f32 to vector<1x256xf32>
    %20 = arith.mulf %18, %19 : vector<1x256xf32>
    %cst_9 = arith.constant 1.500000e+01 : f32
    %21 = vector.broadcast %cst_9 : f32 to vector<1x256xf32>
    %22 = arith.divf %8, %21 : vector<1x256xf32>
    %cst_10 = arith.constant 5.000000e-01 : f32
    %23 = vector.broadcast %cst_10 : f32 to vector<1x256xf32>
    %24 = arith.subf %22, %23 : vector<1x256xf32>
    %cst_11 = arith.constant 2.000000e+00 : f32
    %25 = vector.broadcast %cst_11 : f32 to vector<1x256xf32>
    %26 = arith.mulf %25, %24 : vector<1x256xf32>
    %cst_12 = arith.constant 1.000000e+00 : f32
    %27 = vector.broadcast %cst_12 : f32 to vector<1x256xf32>
    %28 = arith.addf %26, %27 : vector<1x256xf32>
    %cst_13 = arith.constant 5.000000e-01 : f32
    %29 = vector.broadcast %cst_13 : f32 to vector<1x256xf32>
    %30 = arith.mulf %28, %29 : vector<1x256xf32>
    %cst_14 = arith.constant 1.500000e+01 : f32
    %31 = vector.broadcast %cst_14 : f32 to vector<1x256xf32>
    %32 = arith.mulf %30, %31 : vector<1x256xf32>
    %33 = math.floor %20 : vector<1x256xf32>
    %34 = math.floor %32 : vector<1x256xf32>
    %35 = arith.subf %20, %33 : vector<1x256xf32>
    %36 = arith.subf %32, %34 : vector<1x256xf32>
    %37 = arith.fptosi %33 : vector<1x256xf32> to vector<1x256xi32>
    %38 = arith.fptosi %34 : vector<1x256xf32> to vector<1x256xi32>
    %39 = tpu.iota {dimensions = array<i32: 0>} : vector<16x256xi32>
    %c0_i32 = arith.constant 0 : i32
    %40 = vector.broadcast %c0_i32 : i32 to vector<1x256xi32>
    %41 = arith.cmpi sge, %38, %40 : vector<1x256xi32>
    %c16_i32 = arith.constant 16 : i32
    %42 = vector.broadcast %c16_i32 : i32 to vector<1x256xi32>
    %43 = arith.cmpi slt, %38, %42 : vector<1x256xi32>
    %44 = arith.andi %41, %43 : vector<1x256xi1>
    %c1_i32 = arith.constant 1 : i32
    %45 = vector.broadcast %c1_i32 : i32 to vector<1x256xi32>
    %46 = arith.addi %38, %45 : vector<1x256xi32>
    %c0_i32_15 = arith.constant 0 : i32
    %47 = vector.broadcast %c0_i32_15 : i32 to vector<1x256xi32>
    %48 = arith.cmpi sge, %46, %47 : vector<1x256xi32>
    %c1_i32_16 = arith.constant 1 : i32
    %49 = vector.broadcast %c1_i32_16 : i32 to vector<1x256xi32>
    %50 = arith.addi %38, %49 : vector<1x256xi32>
    %c16_i32_17 = arith.constant 16 : i32
    %51 = vector.broadcast %c16_i32_17 : i32 to vector<1x256xi32>
    %52 = arith.cmpi slt, %50, %51 : vector<1x256xi32>
    %53 = arith.andi %48, %52 : vector<1x256xi1>
    %54 = vector.broadcast %38 : vector<1x256xi32> to vector<16x256xi32>
    %55 = arith.cmpi eq, %39, %54 : vector<16x256xi32>
    %56 = vector.broadcast %44 : vector<1x256xi1> to vector<16x256xi1>
    %57 = arith.andi %55, %56 : vector<16x256xi1>
    %cst_18 = arith.constant 1.000000e+00 : f32
    %58 = vector.broadcast %cst_18 : f32 to vector<1x256xf32>
    %59 = arith.subf %58, %36 : vector<1x256xf32>
    %cst_19 = arith.constant 0.000000e+00 : f32
    %60 = vector.shape_cast %59 : vector<1x256xf32> to vector<1x256xf32>
    %61 = vector.broadcast %60 : vector<1x256xf32> to vector<16x256xf32>
    %62 = vector.broadcast %cst_19 : f32 to vector<16x256xf32>
    %63 = arith.select %57, %61, %62 : vector<16x256xi1>, vector<16x256xf32>
    %c1_i32_20 = arith.constant 1 : i32
    %64 = vector.broadcast %c1_i32_20 : i32 to vector<1x256xi32>
    %65 = arith.addi %38, %64 : vector<1x256xi32>
    %66 = vector.broadcast %65 : vector<1x256xi32> to vector<16x256xi32>
    %67 = arith.cmpi eq, %39, %66 : vector<16x256xi32>
    %68 = vector.broadcast %53 : vector<1x256xi1> to vector<16x256xi1>
    %69 = arith.andi %67, %68 : vector<16x256xi1>
    %cst_21 = arith.constant 0.000000e+00 : f32
    %70 = vector.shape_cast %36 : vector<1x256xf32> to vector<1x256xf32>
    %71 = vector.broadcast %70 : vector<1x256xf32> to vector<16x256xf32>
    %72 = vector.broadcast %cst_21 : f32 to vector<16x256xf32>
    %73 = arith.select %69, %71, %72 : vector<16x256xi1>, vector<16x256xf32>
    %74 = arith.addf %63, %73 : vector<16x256xf32>
    %75 = tpu.iota {dimensions = array<i32: 0>} : vector<16x256xi32>
    %c0_i32_22 = arith.constant 0 : i32
    %76 = vector.broadcast %c0_i32_22 : i32 to vector<1x256xi32>
    %77 = arith.cmpi sge, %37, %76 : vector<1x256xi32>
    %c16_i32_23 = arith.constant 16 : i32
    %78 = vector.broadcast %c16_i32_23 : i32 to vector<1x256xi32>
    %79 = arith.cmpi slt, %37, %78 : vector<1x256xi32>
    %80 = arith.andi %77, %79 : vector<1x256xi1>
    %c1_i32_24 = arith.constant 1 : i32
    %81 = vector.broadcast %c1_i32_24 : i32 to vector<1x256xi32>
    %82 = arith.addi %37, %81 : vector<1x256xi32>
    %c0_i32_25 = arith.constant 0 : i32
    %83 = vector.broadcast %c0_i32_25 : i32 to vector<1x256xi32>
    %84 = arith.cmpi sge, %82, %83 : vector<1x256xi32>
    %c1_i32_26 = arith.constant 1 : i32
    %85 = vector.broadcast %c1_i32_26 : i32 to vector<1x256xi32>
    %86 = arith.addi %37, %85 : vector<1x256xi32>
    %c16_i32_27 = arith.constant 16 : i32
    %87 = vector.broadcast %c16_i32_27 : i32 to vector<1x256xi32>
    %88 = arith.cmpi slt, %86, %87 : vector<1x256xi32>
    %89 = arith.andi %84, %88 : vector<1x256xi1>
    %90 = vector.broadcast %37 : vector<1x256xi32> to vector<16x256xi32>
    %91 = arith.cmpi eq, %75, %90 : vector<16x256xi32>
    %92 = vector.broadcast %80 : vector<1x256xi1> to vector<16x256xi1>
    %93 = arith.andi %91, %92 : vector<16x256xi1>
    %cst_28 = arith.constant 1.000000e+00 : f32
    %94 = vector.broadcast %cst_28 : f32 to vector<1x256xf32>
    %95 = arith.subf %94, %35 : vector<1x256xf32>
    %cst_29 = arith.constant 0.000000e+00 : f32
    %96 = vector.shape_cast %95 : vector<1x256xf32> to vector<1x256xf32>
    %97 = vector.broadcast %96 : vector<1x256xf32> to vector<16x256xf32>
    %98 = vector.broadcast %cst_29 : f32 to vector<16x256xf32>
    %99 = arith.select %93, %97, %98 : vector<16x256xi1>, vector<16x256xf32>
    %c1_i32_30 = arith.constant 1 : i32
    %100 = vector.broadcast %c1_i32_30 : i32 to vector<1x256xi32>
    %101 = arith.addi %37, %100 : vector<1x256xi32>
    %102 = vector.broadcast %101 : vector<1x256xi32> to vector<16x256xi32>
    %103 = arith.cmpi eq, %75, %102 : vector<16x256xi32>
    %104 = vector.broadcast %89 : vector<1x256xi1> to vector<16x256xi1>
    %105 = arith.andi %103, %104 : vector<16x256xi1>
    %cst_31 = arith.constant 0.000000e+00 : f32
    %106 = vector.shape_cast %35 : vector<1x256xf32> to vector<1x256xf32>
    %107 = vector.broadcast %106 : vector<1x256xf32> to vector<16x256xf32>
    %108 = vector.broadcast %cst_31 : f32 to vector<16x256xf32>
    %109 = arith.select %105, %107, %108 : vector<16x256xi1>, vector<16x256xf32>
    %110 = arith.addf %99, %109 : vector<16x256xf32>
    %c0_32 = arith.constant 0 : index
    %c0_33 = arith.constant 0 : index
    %c0_34 = arith.constant 0 : index
    %111 = vector.load %arg4[%c0_32, %c0_33, %c0_34] : memref<1x128x16xf32, #tpu.memory_space<vmem>>, vector<1x128x16xf32>
    %112 = vector.shape_cast %111 : vector<1x128x16xf32> to vector<128x16xf32>
    %cst_35 = arith.constant dense<0.000000e+00> : vector<128x256xf32>
    %113 = tpu.matmul %112, %74, %cst_35 {dimension_numbers = #tpu.dot_dimension_numbers<[1], [0], [0], [1], [0, 0, 1, 1], [], []>} : vector<128x16xf32>, vector<16x256xf32>, vector<128x256xf32> -> vector<128x256xf32>
    %114 = vector.extract_strided_slice %113 {offsets = [0, 0], sizes = [16, 256], strides = [1, 1]} : vector<128x256xf32> to vector<16x256xf32>
    %115 = arith.mulf %114, %110 : vector<16x256xf32>
    %cst_36 = arith.constant dense<0.000000e+00> : vector<256xf32>
    %116 = vector.multi_reduction <add>, %115, %cst_36 [0] : vector<16x256xf32> to vector<256xf32>
    %117 = vector.shape_cast %116 : vector<256xf32> to vector<1x256xf32>
    %118 = vector.extract_strided_slice %113 {offsets = [16, 0], sizes = [16, 256], strides = [1, 1]} : vector<128x256xf32> to vector<16x256xf32>
    %119 = arith.mulf %118, %110 : vector<16x256xf32>
    %cst_37 = arith.constant dense<0.000000e+00> : vector<256xf32>
    %120 = vector.multi_reduction <add>, %119, %cst_37 [0] : vector<16x256xf32> to vector<256xf32>
    %121 = vector.shape_cast %120 : vector<256xf32> to vector<1x256xf32>
    %122 = vector.extract_strided_slice %113 {offsets = [32, 0], sizes = [16, 256], strides = [1, 1]} : vector<128x256xf32> to vector<16x256xf32>
    %123 = arith.mulf %122, %110 : vector<16x256xf32>
    %cst_38 = arith.constant dense<0.000000e+00> : vector<256xf32>
    %124 = vector.multi_reduction <add>, %123, %cst_38 [0] : vector<16x256xf32> to vector<256xf32>
    %125 = vector.shape_cast %124 : vector<256xf32> to vector<1x256xf32>
    %126 = vector.extract_strided_slice %113 {offsets = [48, 0], sizes = [16, 256], strides = [1, 1]} : vector<128x256xf32> to vector<16x256xf32>
    %127 = arith.mulf %126, %110 : vector<16x256xf32>
    %cst_39 = arith.constant dense<0.000000e+00> : vector<256xf32>
    %128 = vector.multi_reduction <add>, %127, %cst_39 [0] : vector<16x256xf32> to vector<256xf32>
    %129 = vector.shape_cast %128 : vector<256xf32> to vector<1x256xf32>
    %130 = vector.extract_strided_slice %113 {offsets = [64, 0], sizes = [16, 256], strides = [1, 1]} : vector<128x256xf32> to vector<16x256xf32>
    %131 = arith.mulf %130, %110 : vector<16x256xf32>
    %cst_40 = arith.constant dense<0.000000e+00> : vector<256xf32>
    %132 = vector.multi_reduction <add>, %131, %cst_40 [0] : vector<16x256xf32> to vector<256xf32>
    %133 = vector.shape_cast %132 : vector<256xf32> to vector<1x256xf32>
    %134 = vector.extract_strided_slice %113 {offsets = [80, 0], sizes = [16, 256], strides = [1, 1]} : vector<128x256xf32> to vector<16x256xf32>
    %135 = arith.mulf %134, %110 : vector<16x256xf32>
    %cst_41 = arith.constant dense<0.000000e+00> : vector<256xf32>
    %136 = vector.multi_reduction <add>, %135, %cst_41 [0] : vector<16x256xf32> to vector<256xf32>
    %137 = vector.shape_cast %136 : vector<256xf32> to vector<1x256xf32>
    %138 = vector.extract_strided_slice %113 {offsets = [96, 0], sizes = [16, 256], strides = [1, 1]} : vector<128x256xf32> to vector<16x256xf32>
    %139 = arith.mulf %138, %110 : vector<16x256xf32>
    %cst_42 = arith.constant dense<0.000000e+00> : vector<256xf32>
    %140 = vector.multi_reduction <add>, %139, %cst_42 [0] : vector<16x256xf32> to vector<256xf32>
    %141 = vector.shape_cast %140 : vector<256xf32> to vector<1x256xf32>
    %142 = vector.extract_strided_slice %113 {offsets = [112, 0], sizes = [16, 256], strides = [1, 1]} : vector<128x256xf32> to vector<16x256xf32>
    %143 = arith.mulf %142, %110 : vector<16x256xf32>
    %cst_43 = arith.constant dense<0.000000e+00> : vector<256xf32>
    %144 = vector.multi_reduction <add>, %143, %cst_43 [0] : vector<16x256xf32> to vector<256xf32>
    %145 = vector.shape_cast %144 : vector<256xf32> to vector<1x256xf32>
    %146 = tpu.concatenate %117, %121, %125, %129, %133, %137, %141, %145 in 0 : vector<1x256xf32>, vector<1x256xf32>, vector<1x256xf32>, vector<1x256xf32>, vector<1x256xf32>, vector<1x256xf32>, vector<1x256xf32>, vector<1x256xf32> -> vector<8x256xf32>
    %c0_44 = arith.constant 0 : index
    %c0_45 = arith.constant 0 : index
    %c0_46 = arith.constant 0 : index
    %147 = vector.load %arg5[%c0_44, %c0_45, %c0_46] : memref<1x8x256xf32, #tpu.memory_space<vmem>>, vector<1x8x256xf32>
    %148 = vector.shape_cast %147 : vector<1x8x256xf32> to vector<8x256xf32>
    %149 = vector.shape_cast %146 : vector<8x256xf32> to vector<1x8x256xf32>
    tpu.vector_store %arg5[%c0_44, %c0_45, %c0_46], %149 {strides = array<i32>} : memref<1x8x256xf32, #tpu.memory_space<vmem>>, vector<1x8x256xf32>,
    return
  }
  func.func @transform_0(%arg0: i32, %arg1: i32) -> (i32, i32) {
    %c0_i32 = arith.constant 0 : i32
    %c0_i32_0 = arith.constant 0 : i32
    return %c0_i32, %arg1 : i32, i32
  }
  func.func @transform_1(%arg0: i32, %arg1: i32) -> (i32, i32, i32) {
    %c0_i32 = arith.constant 0 : i32
    %c0_i32_0 = arith.constant 0 : i32
    return %arg0, %c0_i32, %arg1 : i32, i32, i32
  }
  func.func @transform_2(%arg0: i32, %arg1: i32) -> (i32, i32, i32) {
    %c0_i32 = arith.constant 0 : i32
    %c0_i32_0 = arith.constant 0 : i32
    %c0_i32_1 = arith.constant 0 : i32
    return %arg0, %c0_i32, %c0_i32_0 : i32, i32, i32
  }
  func.func @transform_3(%arg0: i32, %arg1: i32) -> (i32, i32, i32) {
    %c0_i32 = arith.constant 0 : i32
    %c0_i32_0 = arith.constant 0 : i32
    return %arg0, %c0_i32, %arg1 : i32, i32, i32
  }
}

</mosaic_0001>

<bundles_post_ra>
// kernel: spatial_transformer_forward.1
= control target key start
LH: loop header
LB: loop body
LE: loop exit
PB: predicated region body
PF: predicated region fallthrough
CT: control target
= control target key end

     0   :  { %s1163_s12 = smov 0   ;;  %s1165_s13 = smov 0   ;;  %s1556_s0 = inlined_call_operand.vmem [shape: f32[2,256], index: 0, kind: input, shape index: {}]   ;;  %s1557_s1 = inlined_call_operand.vmem [shape: f32[2,2,256], index: 1, kind: input, shape index: {}]   ;;  %s1558_s2 = inlined_call_operand.vmem [shape: f32[2,128,16], index: 2, kind: input, shape index: {}]   ;;  %s1559_s3 = inlined_call_operand.vmem [shape: f32[2,8,256], index: 3, kind: output, shape index: {}]  }
   0x1   :  { %s1167_s14 = smov 0  }
   0x2 LB: > { %s25_s15 = sadd.s32 1, %s1135_s13  ;;  %p1056_p0 = scmp.ge.s32.totalorder %s1139_s14, 1  ;;  %s1139_s14 = sphi %s1167_s14, %s13_s14   ;;  %s1135_s13 = sphi %s1165_s13, %s1579_s13   ;;  %s1131_s12 = sphi %s1163_s12, %s1578_s12  }
   0x3   : > { %p27_p1 = scmp.ge.s32.totalorder %s25_s15, 2  ;;  %p179_p2 = scmp.lt.s32.totalorder %s1139_s14, 3 }
   0x5   : > { %s1581_s15 = smov (%p27_p1, %s25_s15), 0  ;;  %p180_p3 = pnand %p1056_p0, %p179_p2 }
   0x6   : > { %p228_p4 = scmp.lt.s32.totalorder (!%p180_p3), %s1131_s12, 1 }
   0x7   : > { %183 = sbr.rel (%p180_p3) target bundleno = 313 (0x139), region = 32 }
   0xc   : > { %v1141_v0 = vmov 0.0   ;;  %s1583_s12 = smov (!%p228_p4, %s1131_s12), 1  ;;  %v252_v1 = vld [vmem:[%s1556_s0] sm:$0xf]  ;;  %v265_v8 = vlaneseq  ;;  %v1142_v32 = vmov 0  }
   0xd   : > { %673 = vmatprep.mubr.f32.mxu0 %v1141_v0  ;;  %721 = vmatprep.mubr.f32.mxu1 %v1141_v0  ;;  %s1082_s16 = sshll.u32 %s1583_s12, 2  ;;  %s1083_s22 = sshll.u32 %s1583_s12, 7 }
   0xe   : > { %s235_s21 = scalar_lea.vmem %s1557_s1, %s1082_s16  ;;  %v1192_v11 = vshrl.u32 %v265_v8, 7  ;;  %s1433_s25 = scalar_lea.vmem %s1558_s2, %s1083_s22 }
   0xf   : > { %v253_v2 = vld [vmem:[%s235_s21] sm:$0xf]  ;;  %v547_v50 = vld [vmem:[%s1433_s25 + $0x18] sm:$0xff]  ;;  %s1084_s26 = sshll.u32 %s1583_s12, 4 }
  0x10   : > { %v254_v3 = vadd.f32 %v253_v2, %v252_v1  ;;  %v281_v15 = vsub.s32 3, %v1192_v11  ;;  %v1198_v16 = vsub.s32 0, %v1192_v11  ;;  %v1201_v17 = vsub.s32 2, %v1192_v11  ;;  %s250_s29 = scalar_lea.vmem %s1559_s3, %s1084_s26 }
  0x11   : > { %v1206_v19 = vsub.s32 1, %v1192_v11  ;;  %v1214_v22 = vadd.s32 8, %v1192_v11 }
  0x12   : > { %v256_v4 = vmul.f32 0.06666667, %v254_v3 }
  0x14   : > { %v1063_v5 = vadd.f32 -0.5, %v256_v4 }
  0x16   : > { %v258_v6 = vmul.f32 2.0, %v1063_v5 }
  0x18   : > { %v259_v7 = vadd.f32 1.0, %v258_v6 }
  0x1a   : > { %v260_v9 = vmul.f32 0.5, %v259_v7 }
  0x1c   : > { %v261_v10 = vmul.f32 15.0, %v260_v9 }
  0x1e   : > { %v262_v12 = vfloor.f32 %v261_v10 }
  0x20   : > { %v1194_v13 = vsub.f32 %v261_v10, %v262_v12  ;;  %v1089_v14 = vtrunc.f32 %v262_v12 }
  0x22   : > { %v1203_v18 = vcvt.f32.s32 %v1089_v14  ;;  %v1209_v20 = vsub.f32 1.0, %v1194_v13  ;;  %v521_v21 = vrot.slane %v1194_v13, %v1198_v16  ;;  %v393_v23 = vrot.slane %v1194_v13, %v281_v15 }
  0x23   : > { %v525_v24 = vrot.slane %v1194_v13, %v1201_v17  ;;  %v389_v30 = vrot.slane %v1194_v13, %v1206_v19 }
  0x24   : > { %vm268_vm0 = vcmp.ge.s32.totalorder %v1203_v18, 0  ;;  %vm269_vm1 = vcmp.lt.s32.totalorder %v1203_v18, 16  ;;  %v1222_v25 = vadd.s32 1, %v1203_v18  ;;  %v282_v26 = vrot.slane %v1203_v18, %v281_v15 }
  0x25   : > { %vm270_vm2 = vmand %vm268_vm0, %vm269_vm1  ;;  %v327_v27 = vrot.slane %v1209_v20, %v281_v15  ;;  %v415_v28 = vrot.slane %v1203_v18, %v1198_v16  ;;  %v419_v29 = vrot.slane %v1203_v18, %v1201_v17  ;;  %v1240_v36 = vrot.slane %v393_v23, %v1206_v19 }
  0x26   : > { %vm272_vm3 = vcmp.ge.s32.totalorder %v1222_v25, 0  ;;  %vm273_vm4 = vcmp.lt.s32.totalorder %v1222_v25, 16  ;;  %v290_v31 = vrot.slane %v282_v26, %v1206_v19  ;;  %v1235_v33 = vsel %vm270_vm2, 1, %v1142_v32 }
  0x27   : > { %vm274_vm5 = vmand %vm272_vm3, %vm273_vm4  ;;  %v303_v34 = vrot.slane %v1235_v33, %v281_v15  ;;  %v349_v35 = vrot.slane %v1222_v25, %v281_v15  ;;  %v423_v37 = vrot.slane %v415_v28, %v1198_v16  ;;  %v1245_v38 = vrot.slane %v327_v27, %v1206_v19 }
  0x28   : > { %vm294_vm6 = vcmp.eq.s32.totalorder %v1214_v22, %v290_v31  ;;  %v1247_v39 = vsel %vm274_vm5, 1, %v1142_v32  ;;  %v427_v40 = vrot.slane %v419_v29, %v1198_v16  ;;  %v435_v44 = vrot.slane %v1235_v33, %v1198_v16 }
  0x29   : > { %v311_v41 = vrot.slane %v303_v34, %v1206_v19  ;;  %v1252_v42 = vrot.slane %v349_v35, %v1206_v19  ;;  %v370_v43 = vrot.slane %v1247_v39, %v281_v15  ;;  %vm428_vm7 = vcmp.eq.s32.totalorder %v1192_v11, %v423_v37 }
  0x2a   : > { %vm429_vm8 = vcmp.eq.s32.totalorder %v1192_v11, %v427_v40  ;;  %vm430_vm9 = vcmp.eq.s32.totalorder %v1214_v22, %v423_v37  ;;  %vm431_vm10 = vcmp.eq.s32.totalorder %v1214_v22, %v427_v40  ;;  %vm292_vm11 = vcmp.eq.s32.totalorder %v1192_v11, %v290_v31 }
  0x2b   : > { %vm313_vm12 = vcmp.eq.s32.totalorder %v311_v41, 1  ;;  %vm361_vm13 = vcmp.eq.s32.totalorder %v1214_v22, %v1252_v42  ;;  %v1265_v45 = vrot.slane %v370_v43, %v1206_v19  ;;  %v439_v46 = vrot.slane %v1235_v33, %v1201_v17 }
  0x2c   : > { %v443_v47 = vrot.slane %v435_v44, %v1198_v16  ;;  %v457_v48 = vrot.slane %v1209_v20, %v1198_v16  ;;  %v461_v49 = vrot.slane %v1209_v20, %v1201_v17  ;;  %vm1277_vm14 = vmand %vm294_vm6, %vm313_vm12  ;;  %vm359_vm15 = vcmp.eq.s32.totalorder %v1192_v11, %v1252_v42  ;;  %v544_v44 = vld [vmem:[%s1433_s25] sm:$0xff] }
  0x2d   : > { %vm380_vm0 = vcmp.eq.s32.totalorder %v1265_v45, 1  ;;  %v479_v51 = vrot.slane %v1222_v25, %v1198_v16  ;;  %v483_v52 = vrot.slane %v1222_v25, %v1201_v17  ;;  %v499_v53 = vrot.slane %v1247_v39, %v1198_v16  ;;  %vm1308_vm3 = vmand %vm292_vm11, %vm313_vm12  ;;  %v552_v45 = vld [vmem:[%s1433_s25 + $0x40] sm:$0xff] }
  0x2e   : > { %v341_v54 = vsel %vm1277_vm14, %v1245_v38, 0.0  ;;  %v447_v55 = vrot.slane %v439_v46, %v1198_v16  ;;  %vm448_vm1 = vcmp.eq.s32.totalorder %v443_v47, 1  ;;  %v467_v56 = vrot.slane %v457_v48, %v1198_v16  ;;  %vm384_vm2 = vmand %vm361_vm13, %vm380_vm0  ;;  %v545_v46 = vld [vmem:[%s1433_s25 + $0x8] sm:$0xff]  ;;  %v546_v48 = vld [vmem:[%s1433_s25 + $0x10] sm:$0xff] }
  0x2f   : > { %v471_v57 = vrot.slane %v461_v49, %v1198_v16  ;;  %v487_v58 = vrot.slane %v479_v51, %v1198_v16  ;;  %v491_v59 = vrot.slane %v483_v52, %v1198_v16  ;;  %v503_v60 = vrot.slane %v1247_v39, %v1201_v17  ;;  %vm1316_vm5 = vmand %vm428_vm7, %vm448_vm1  ;;  %v553_v47 = vld [vmem:[%s1433_s25 + $0x48] sm:$0xff]  ;;  %v554_v49 = vld [vmem:[%s1433_s25 + $0x50] sm:$0xff] }
  0x30   : > { %v407_v62 = vsel %vm384_vm2, %v1240_v36, 0.0  ;;  %vm449_vm4 = vcmp.eq.s32.totalorder %v447_v55, 1  ;;  %v507_v1 = vrot.slane %v499_v53, %v1198_v16  ;;  %v531_v2 = vrot.slane %v521_v21, %v1198_v16  ;;  %vm1338_vm12 = vmand %vm430_vm9, %vm448_vm1  ;;  %v555_v51 = vld [vmem:[%s1433_s25 + $0x58] sm:$0xff]  ;;  %v548_v52 = vld [vmem:[%s1433_s25 + $0x20] sm:$0xff] }
  0x31   : > { %v411_v3 = vadd.f32 %v407_v62, %v341_v54  ;;  %vm1327_vm6 = vmand %vm429_vm8, %vm449_vm4  ;;  %v472_v5 = vsel %vm1316_vm5, %v467_v56, 0.0  ;;  %vm492_vm7 = vcmp.eq.s32.totalorder %v1192_v11, %v487_v58  ;;  %vm493_vm11 = vcmp.eq.s32.totalorder %v1192_v11, %v491_v59  ;;  %v556_v53 = vld [vmem:[%s1433_s25 + $0x60] sm:$0xff]  ;;  %v549_v54 = vld [vmem:[%s1433_s25 + $0x28] sm:$0xff] }
  0x32   : > { %v473_v7 = vsel %vm1327_vm6, %v471_v57, 0.0  ;;  %vm494_vm8 = vcmp.eq.s32.totalorder %v1214_v22, %v487_v58  ;;  %vm495_vm13 = vcmp.eq.s32.totalorder %v1214_v22, %v491_v59  ;;  %v511_v8 = vrot.slane %v503_v60, %v1198_v16  ;;  %vm1349_vm14 = vmand %vm431_vm10, %vm449_vm4  ;;  %v557_v55 = vld [vmem:[%s1433_s25 + $0x68] sm:$0xff]  ;;  %v551_v58 = vld [vmem:[%s1433_s25 + $0x38] sm:$0xff] }
  0x33   : > { %v474_v10 = vsel %vm1338_vm12, %v467_v56, 0.0  ;;  %vm512_vm9 = vcmp.eq.s32.totalorder %v507_v1, 1  ;;  %v535_v12 = vrot.slane %v525_v24, %v1198_v16  ;;  %637 = vmatprep.subr.mxu0 %v411_v3  ;;  %1085 = vmatprep.subr.mxu1 %v411_v3  ;;  %v278_v14 = vrot.slane %v1203_v18, %v1206_v19  ;;  %v550_v56 = vld [vmem:[%s1433_s25 + $0x30] sm:$0xff]  ;;  %v559_v59 = vld [vmem:[%s1433_s25 + $0x78] sm:$0xff] }
  0x34   : > { %v475_v15 = vsel %vm1349_vm14, %v471_v57, 0.0  ;;  %vm513_vm10 = vcmp.eq.s32.totalorder %v511_v8, 1  ;;  %vm514_vm1 = vmand %vm492_vm7, %vm512_vm9  ;;  %v299_v21 = vrot.slane %v1235_v33, %v1206_v19  ;;  %v323_v17 = vrot.slane %v1209_v20, %v1206_v19  ;;  %v558_v57 = vld [vmem:[%s1433_s25 + $0x70] sm:$0xff] }
  0x35   : > { %vm515_vm2 = vmand %vm493_vm11, %vm513_vm10  ;;  %v536_v16 = vsel %vm514_vm1, %v531_v2, 0.0  ;;  %v286_v18 = vrot.slane %v278_v14, %v1206_v19  ;;  %v345_v23 = vrot.slane %v1222_v25, %v1206_v19  ;;  %v366_v24 = vrot.slane %v1247_v39, %v1206_v19 }
  0x36   : > { %vm516_vm4 = vmand %vm494_vm8, %vm512_vm9  ;;  %v537_v26 = vsel %vm515_vm2, %v535_v12, 0.0  ;;  %v1380_v27 = vadd.f32 %v536_v16, %v472_v5  ;;  %v307_v20 = vrot.slane %v299_v21, %v1206_v19  ;;  %v333_v28 = vrot.slane %v323_v17, %v1206_v19 }
  0x37   : > { %vm517_vm5 = vmand %vm495_vm13, %vm513_vm10  ;;  %v538_v29 = vsel %vm516_vm4, %v531_v2, 0.0  ;;  %v1386_v25 = vadd.f32 %v537_v26, %v473_v7  ;;  %vm291_vm6 = vcmp.eq.s32.totalorder %v1192_v11, %v286_v18  ;;  %vm293_vm7 = vcmp.eq.s32.totalorder %v1214_v22, %v286_v18 }
  0x38   : > { %vm1395_vm11 = vmand %vm359_vm15, %vm380_vm0  ;;  %v539_v32 = vsel %vm517_vm5, %v535_v12, 0.0  ;;  %v1399_v33 = vadd.f32 %v538_v29, %v474_v10  ;;  %vm312_vm12 = vcmp.eq.s32.totalorder %v307_v20, 1  ;;  %v353_v34 = vrot.slane %v345_v23, %v1206_v19 }
  0x39   : > { %v1402_v35 = vadd.f32 %v539_v32, %v475_v15  ;;  %vm1404_vm8 = vmand %vm291_vm6, %vm312_vm12  ;;  %v374_v39 = vrot.slane %v366_v24, %v1206_v19  ;;  %v399_v41 = vrot.slane %v389_v30, %v1206_v19  ;;  %v339_v42 = vsel %vm1308_vm3, %v1245_v38, 0.0 }
  0x3a   : > { %vm1409_vm13 = vmand %vm293_vm7, %vm312_vm12  ;;  %vm358_vm15 = vcmp.eq.s32.totalorder %v1192_v11, %v353_v34  ;;  %vm360_vm0 = vcmp.eq.s32.totalorder %v1214_v22, %v353_v34  ;;  %v405_v43 = vsel %vm1395_vm11, %v1240_v36, 0.0  ;;  %v338_v22 = vsel %vm1404_vm8, %v333_v28, 0.0 }
  0x3b   : > { %vm379_vm14 = vcmp.eq.s32.totalorder %v374_v39, 1  ;;  %v340_v11 = vsel %vm1409_vm13, %v333_v28, 0.0  ;;  %v409_v30 = vadd.f32 %v405_v43, %v339_v42  ;;  %vm560_vm3 = vcmask 130048  }
  0x3c   : > { %vm381_vm9 = vmand %vm358_vm15, %vm379_vm14  ;;  %vm914_vm1 = vcmask 1040384   ;;  %vm917_vm2 = vcmask 1041408   ;;  %vm920_vm4 = vcmask 1042432   ;;  %vm923_vm5 = vcmask 1043456  }
  0x3d   : > { %vm383_vm10 = vmand %vm360_vm0, %vm379_vm14  ;;  %v404_v13 = vsel %vm381_vm9, %v399_v41, 0.0  ;;  %vm926_vm6 = vcmask 1044480   ;;  %vm929_vm7 = vcmask 1045504   ;;  %vm932_vm11 = vcmask 1046528  }
  0x3e   : > { %v406_v19 = vsel %vm383_vm10, %v399_v41, 0.0  ;;  %v408_v38 = vadd.f32 %v404_v13, %v338_v22 }
  0x3f   : > { %v410_v36 = vadd.f32 %v406_v19, %v340_v11 }
  0x41   : > { %638 = vmatpush1.msra.mxu0 %v410_v36  ;;  %1087 = vmatpush1.msra.mxu1 %v410_v36 }
  0x42   : > { %639 = vmatprep.subr.mxu0 %v409_v30  ;;  %1086 = vmatprep.subr.mxu1 %v409_v30 }
  0x43   : > { %640 = vmatpush1.msra.mxu0 %v408_v38  ;;  %1088 = vmatpush1.msra.mxu1 %v408_v38 }
  0x44   : > { %1064 = vmatmul.mubr.msk.f32.vlgmr.msra.gmra.mxu0 %vm560_vm3, %v544_v44  ;;  %1072 = vmatmul.mubr.msk.f32.vlgmr.msra.gmra.mxu1 %vm560_vm3, %v552_v45 }
  0x45   : > { %679 = vmatprep.mubr.f32.mxu0 %v1141_v0  ;;  %727 = vmatprep.mubr.f32.mxu1 %v1141_v0 }
  0x48   : > { %1065 = vmatmul.mubr.msk.f32.gmra.mxu0 %vm560_vm3, %v545_v46  ;;  %1073 = vmatmul.mubr.msk.f32.gmra.mxu1 %vm560_vm3, %v553_v47 }
  0x49   : > { %685 = vmatprep.mubr.f32.mxu0 %v1141_v0  ;;  %733 = vmatprep.mubr.f32.mxu1 %v1141_v0 }
  0x4c   : > { %1066 = vmatmul.mubr.msk.f32.gmra.mxu0 %vm560_vm3, %v546_v48  ;;  %1074 = vmatmul.mubr.msk.f32.gmra.mxu1 %vm560_vm3, %v554_v49 }
  0x4d   : > { %691 = vmatprep.mubr.f32.mxu0 %v1141_v0  ;;  %739 = vmatprep.mubr.f32.mxu1 %v1141_v0 }
  0x50   : > { %1067 = vmatmul.mubr.msk.f32.gmra.mxu0 %vm560_vm3, %v547_v50  ;;  %1075 = vmatmul.mubr.msk.f32.gmra.mxu1 %vm560_vm3, %v555_v51 }
  0x51   : > { %697 = vmatprep.mubr.f32.mxu0 %v1141_v0  ;;  %745 = vmatprep.mubr.f32.mxu1 %v1141_v0 }
  0x54   : > { %1068 = vmatmul.mubr.msk.f32.gmra.mxu0 %vm560_vm3, %v548_v52  ;;  %1076 = vmatmul.mubr.msk.f32.gmra.mxu1 %vm560_vm3, %v556_v53 }
  0x55   : > { %703 = vmatprep.mubr.f32.mxu0 %v1141_v0  ;;  %751 = vmatprep.mubr.f32.mxu1 %v1141_v0 }
  0x58   : > { %1069 = vmatmul.mubr.msk.f32.gmra.mxu0 %vm560_vm3, %v549_v54  ;;  %1077 = vmatmul.mubr.msk.f32.gmra.mxu1 %vm560_vm3, %v557_v55 }
  0x59   : > { %709 = vmatprep.mubr.f32.mxu0 %v1141_v0  ;;  %757 = vmatprep.mubr.f32.mxu1 %v1141_v0 }
  0x5c   : > { %1070 = vmatmul.mubr.msk.f32.gmra.mxu0 %vm560_vm3, %v550_v56  ;;  %1078 = vmatmul.mubr.msk.f32.gmra.mxu1 %vm560_vm3, %v558_v57 }
  0x5d   : > { %715 = vmatprep.mubr.f32.mxu0 %v1141_v0  ;;  %763 = vmatprep.mubr.f32.mxu1 %v1141_v0 }
  0x60   : > { %1071 = vmatmul.mubr.msk.f32.gmra.mxu0 %vm560_vm3, %v551_v58  ;;  %1079 = vmatmul.mubr.msk.f32.gmra.mxu1 %vm560_vm3, %v559_v59 }
 0x104   : > { %v675_v60 = vpop.f32.mrf.mxu0  ;;  %v723_v61 = vpop.f32.mrf.mxu1 }
 0x105   : > { %v842_v1 = vmul.f32 %v723_v61, %v1380_v27  ;;  %v770_v4 = vmul.f32 %v675_v60, %v1380_v27 }
 0x106   : > { %v677_v62 = vpop.f32.mrf.mxu0  ;;  %v725_v63 = vpop.f32.mrf.mxu1 }
 0x107   : > { %v771_v6 = vmul.f32 %v677_v62, %v1386_v25  ;;  %v843_v7 = vmul.f32 %v725_v63, %v1386_v25 }
 0x108   : > { %v681_v2 = vpop.f32.mrf.mxu0  ;;  %v729_v3 = vpop.f32.mrf.mxu1 }
 0x109   : > { %v772_v5 = vmul.f32 %v681_v2, %v1399_v33  ;;  %v844_v0 = vmul.f32 %v729_v3, %v1399_v33 }
 0x10a   : > { %v683_v8 = vpop.f32.mrf.mxu0  ;;  %v731_v9 = vpop.f32.mrf.mxu1 }
 0x10b   : > { %v774_v10 = vadd.f32 %v772_v5, %v770_v4  ;;  %v846_v12 = vadd.f32 %v844_v0, %v842_v1  ;;  %v773_v14 = vmul.f32 %v683_v8, %v1402_v35  ;;  %v845_v15 = vmul.f32 %v731_v9, %v1402_v35 }
 0x10c   : > { %v687_v21 = vpop.f32.mrf.mxu0  ;;  %v735_v17 = vpop.f32.mrf.mxu1 }
 0x10d   : > { %v775_v16 = vrot.slane %v774_v10, 4  ;;  %v781_v18 = vadd.f32 %v773_v14, %v771_v6  ;;  %v853_v23 = vadd.f32 %v845_v15, %v843_v7  ;;  %v860_v29 = vmul.f32 %v735_v17, %v1380_v27 }
 0x10e   : > { %v689_v24 = vpop.f32.mrf.mxu0  ;;  %v737_v26 = vpop.f32.mrf.mxu1  ;;  %v847_v34 = vrot.slane %v846_v12, 4  ;;  %v788_v39 = vmul.f32 %v687_v21, %v1380_v27 }
 0x10f   : > { %v776_v20 = vadd.f32 %v775_v16, %v774_v10  ;;  %v782_v28 = vrot.slane %v781_v18, 4  ;;  %v789_v22 = vmul.f32 %v689_v24, %v1386_v25  ;;  %v861_v13 = vmul.f32 %v737_v26, %v1386_v25 }
 0x110   : > { %v693_v31 = vpop.f32.mrf.mxu0  ;;  %v741_v32 = vpop.f32.mrf.mxu1  ;;  %v848_v46 = vadd.f32 %v847_v34, %v846_v12  ;;  %v854_v47 = vrot.slane %v853_v23, 4 }
 0x111   : > { %v783_v37 = vadd.f32 %v782_v28, %v781_v18  ;;  %v790_v40 = vmul.f32 %v693_v31, %v1399_v33  ;;  %v862_v41 = vmul.f32 %v741_v32, %v1399_v33  ;;  %v777_v11 = vrot.slane %v776_v20, 2 }
 0x112   : > { %v695_v42 = vpop.f32.mrf.mxu0  ;;  %v743_v43 = vpop.f32.mrf.mxu1  ;;  %v849_v59 = vrot.slane %v848_v46, 2  ;;  %v1502_v62 = vadd.f32 %v854_v47, %v853_v23 }
 0x113   : > { %v792_v19 = vadd.f32 %v790_v40, %v788_v39  ;;  %v1495_v30 = vadd.f32 %v862_v41, %v860_v29  ;;  %v791_v36 = vmul.f32 %v695_v42, %v1402_v35  ;;  %v863_v38 = vmul.f32 %v743_v43, %v1402_v35 }
 0x114   : > { %v699_v44 = vpop.f32.mrf.mxu0  ;;  %v747_v45 = vpop.f32.mrf.mxu1  ;;  %v784_v48 = vrot.slane %v783_v37, 2  ;;  %v778_v54 = vadd.f32 %v777_v11, %v776_v20  ;;  %v1513_v43 = vadd.f32 %v849_v59, %v848_v46  ;;  %v856_v11 = vrot.slane %v1502_v62, 2 }
 0x115   : > { %v793_v49 = vrot.slane %v792_v19, 4  ;;  %v799_v50 = vadd.f32 %v791_v36, %v789_v22  ;;  %v1499_v51 = vadd.f32 %v863_v38, %v861_v13  ;;  %v878_v60 = vmul.f32 %v747_v45, %v1380_v27 }
 0x116   : > { %v701_v52 = vpop.f32.mrf.mxu0  ;;  %v749_v53 = vpop.f32.mrf.mxu1  ;;  %v785_v61 = vadd.f32 %v784_v48, %v783_v37  ;;  %v779_v4 = vrot.slane %v778_v54, 1  ;;  %v806_v5 = vmul.f32 %v699_v44, %v1380_v27  ;;  %v865_v24 = vrot.slane %v1495_v30, 4 }
 0x117   : > { %v794_v55 = vadd.f32 %v793_v49, %v792_v19  ;;  %v800_v56 = vrot.slane %v799_v50, 4  ;;  %v807_v9 = vmul.f32 %v701_v52, %v1386_v25  ;;  %v879_v10 = vmul.f32 %v749_v53, %v1386_v25 }
 0x118   : > { %v705_v57 = vpop.f32.mrf.mxu0  ;;  %v753_v58 = vpop.f32.mrf.mxu1  ;;  %v786_v18 = vrot.slane %v785_v61, 1  ;;  %v780_v34 = vadd.f32 %v779_v4, %v778_v54  ;;  %v872_v40 = vrot.slane %v1499_v51, 4  ;;  %v866_v38 = vadd.f32 %v865_v24, %v1495_v30 }
 0x119   : > { %v795_v63 = vrot.slane %v794_v55, 2  ;;  %v801_v1 = vadd.f32 %v800_v56, %v799_v50  ;;  %v808_v0 = vmul.f32 %v705_v57, %v1399_v33  ;;  %v880_v6 = vmul.f32 %v753_v58, %v1399_v33 }
 0x11a   : > { %v707_v2 = vpop.f32.mrf.mxu0  ;;  %v755_v3 = vpop.f32.mrf.mxu1  ;;  %v787_v19 = vadd.f32 %v786_v18, %v785_v61  ;;  %v873_v46 = vadd.f32 %v872_v40, %v1499_v51  ;;  %v857_v24 = vadd.f32 %v856_v11, %v1502_v62 }
 0x11b   : > { %v796_v7 = vadd.f32 %v795_v63, %v794_v55  ;;  %v802_v8 = vrot.slane %v801_v1, 2  ;;  %v810_v15 = vadd.f32 %v808_v0, %v806_v5  ;;  %v882_v21 = vadd.f32 %v880_v6, %v878_v60 }
 0x11c   : > { %v711_v12 = vpop.f32.mrf.mxu0  ;;  %v759_v14 = vpop.f32.mrf.mxu1  ;;  %v809_v17 = vmul.f32 %v707_v2, %v1402_v35  ;;  %v881_v16 = vmul.f32 %v755_v3, %v1402_v35  ;;  %v867_v6 = vrot.slane %v866_v38, 2 }
 0x11d   : > { %v797_v23 = vrot.slane %v796_v7, 1  ;;  %v803_v26 = vadd.f32 %v802_v8, %v801_v1  ;;  %v811_v29 = vrot.slane %v810_v15, 4  ;;  %v883_v47 = vrot.slane %v882_v21, 4 }
 0x11e   : > { %v713_v20 = vpop.f32.mrf.mxu0  ;;  %v761_v28 = vpop.f32.mrf.mxu1  ;;  %v817_v31 = vadd.f32 %v809_v17, %v807_v9  ;;  %v889_v32 = vadd.f32 %v881_v16, %v879_v10  ;;  %v824_v54 = vmul.f32 %v711_v12, %v1380_v27  ;;  %v896_v55 = vmul.f32 %v759_v14, %v1380_v27 }
 0x11f   : > { %v798_v37 = vadd.f32 %v797_v23, %v796_v7  ;;  %v804_v39 = vrot.slane %v803_v26, 1  ;;  %v812_v22 = vadd.f32 %v811_v29, %v810_v15  ;;  %v825_v58 = vmul.f32 %v713_v20, %v1386_v25 }
 0x120   : > { %v717_v41 = vpop.f32.mrf.mxu0  ;;  %v765_v42 = vpop.f32.mrf.mxu1  ;;  %v818_v13 = vrot.slane %v817_v31, 4  ;;  %v890_v49 = vrot.slane %v889_v32, 4  ;;  %v897_v30 = vmul.f32 %v761_v28, %v1386_v25  ;;  %v884_v51 = vadd.f32 %v883_v47, %v882_v21 }
 0x121   : > { %v915_v36 = vsel %vm914_vm1, %v780_v34, %v798_v37  ;;  %v805_v44 = vadd.f32 %v804_v39, %v803_v26  ;;  %v813_v45 = vrot.slane %v812_v22, 2  ;;  %v826_v59 = vmul.f32 %v717_v41, %v1399_v33 }
 0x122   : > { %v819_v48 = vadd.f32 %v818_v13, %v817_v31  ;;  %v719_v50 = vpop.f32.mrf.mxu0  ;;  %v767_v52 = vpop.f32.mrf.mxu1  ;;  %v898_v60 = vmul.f32 %v765_v42, %v1399_v33  ;;  %v891_v3 = vadd.f32 %v890_v49, %v889_v32  ;;  %v874_v7 = vrot.slane %v873_v46, 2 }
 0x123   : > { %v916_v53 = vsel %vm914_vm1, %v787_v19, %v805_v44  ;;  %v814_v56 = vadd.f32 %v813_v45, %v812_v22  ;;  %v827_v61 = vmul.f32 %v719_v50, %v1402_v35  ;;  %v899_v63 = vmul.f32 %v767_v52, %v1402_v35 }
 0x124   : > { %v820_v57 = vrot.slane %v819_v48, 2  ;;  %v828_v4 = vadd.f32 %v826_v59, %v824_v54  ;;  %v900_v27 = vadd.f32 %v898_v60, %v896_v55  ;;  %v885_v15 = vrot.slane %v884_v51, 2 }
 0x125   : > { %v815_v1 = vrot.slane %v814_v56, 1  ;;  %v835_v5 = vadd.f32 %v827_v61, %v825_v58  ;;  %v907_v0 = vadd.f32 %v899_v63, %v897_v30  ;;  %v892_v17 = vrot.slane %v891_v3, 2 }
 0x126   : > { %v821_v2 = vadd.f32 %v820_v57, %v819_v48  ;;  %v829_v9 = vrot.slane %v828_v4, 4  ;;  %v901_v10 = vrot.slane %v900_v27, 4  ;;  %v868_v26 = vadd.f32 %v867_v6, %v866_v38 }
 0x127   : > { %v816_v8 = vadd.f32 %v815_v1, %v814_v56  ;;  %v836_v12 = vrot.slane %v835_v5, 4  ;;  %v908_v33 = vrot.slane %v907_v0, 4  ;;  %v875_v20 = vadd.f32 %v874_v7, %v873_v46 }
 0x128   : > { %v822_v25 = vrot.slane %v821_v2, 1  ;;  %v830_v21 = vadd.f32 %v829_v9, %v828_v4  ;;  %v902_v16 = vadd.f32 %v901_v10, %v900_v27  ;;  %v886_v37 = vadd.f32 %v885_v15, %v884_v51 }
 0x129   : > { %v918_v14 = vsel %vm917_vm2, %v915_v36, %v816_v8  ;;  %v837_v18 = vadd.f32 %v836_v12, %v835_v5  ;;  %v909_v23 = vadd.f32 %v908_v33, %v907_v0  ;;  %v893_v39 = vadd.f32 %v892_v17, %v891_v3 }
 0x12a   : > { %v823_v35 = vadd.f32 %v822_v25, %v821_v2  ;;  %v831_v29 = vrot.slane %v830_v21, 2  ;;  %v903_v31 = vrot.slane %v902_v16, 2  ;;  %v851_v13 = vrot.slane %v1513_v43, 1 }
 0x12b   : > { %v838_v32 = vrot.slane %v837_v18, 2  ;;  %v910_v34 = vrot.slane %v909_v23, 2  ;;  %v858_v19 = vrot.slane %v857_v24, 1  ;;  %v869_v62 = vrot.slane %v868_v26, 1 }
 0x12c   : > { %v919_v28 = vsel %vm917_vm2, %v916_v53, %v823_v35  ;;  %v832_v40 = vadd.f32 %v831_v29, %v830_v21  ;;  %v904_v41 = vadd.f32 %v903_v31, %v902_v16  ;;  %v876_v11 = vrot.slane %v875_v20, 1 }
 0x12d   : > { %v839_v42 = vadd.f32 %v838_v32, %v837_v18  ;;  %v911_v22 = vadd.f32 %v910_v34, %v909_v23  ;;  %v887_v44 = vrot.slane %v886_v37, 1  ;;  %v894_v45 = vrot.slane %v893_v39, 1 }
 0x12e   : > { %v833_v36 = vrot.slane %v832_v40, 1  ;;  %v905_v48 = vrot.slane %v904_v41, 1  ;;  %v852_v52 = vadd.f32 %v851_v13, %v1513_v43  ;;  %v859_v53 = vadd.f32 %v858_v19, %v857_v24 }
 0x12f   : > { %v840_v38 = vrot.slane %v839_v42, 1  ;;  %v912_v50 = vrot.slane %v911_v22, 1  ;;  %v870_v46 = vadd.f32 %v869_v62, %v868_v26  ;;  %v877_v54 = vadd.f32 %v876_v11, %v875_v20 }
 0x130   : > { %v834_v47 = vadd.f32 %v833_v36, %v832_v40  ;;  %v888_v57 = vadd.f32 %v887_v44, %v886_v37  ;;  %v895_v58 = vadd.f32 %v894_v45, %v893_v39  ;;  %v906_v43 = vadd.f32 %v905_v48, %v904_v41 }
 0x131   : > { %v841_v49 = vadd.f32 %v840_v38, %v839_v42  ;;  %v913_v61 = vadd.f32 %v912_v50, %v911_v22 }
 0x132   : > { %v921_v55 = vsel %vm920_vm4, %v918_v14, %v834_v47 }
 0x133   : > { %v922_v56 = vsel %vm920_vm4, %v919_v28, %v841_v49  ;;  %v924_v30 = vsel %vm923_vm5, %v921_v55, %v852_v52 }
 0x134   : > { %v925_v59 = vsel %vm923_vm5, %v922_v56, %v859_v53  ;;  %v927_v60 = vsel %vm926_vm6, %v924_v30, %v870_v46 }
 0x135   : > { %v928_v63 = vsel %vm926_vm6, %v925_v59, %v877_v54  ;;  %v930_v1 = vsel %vm929_vm7, %v927_v60, %v888_v57 }
 0x136   : > { %v931_v51 = vsel %vm929_vm7, %v928_v63, %v895_v58  ;;  %v933_v2 = vsel %vm932_vm11, %v930_v1, %v906_v43 }
 0x137   : > { %v934_v3 = vsel %vm932_vm11, %v931_v51, %v913_v61  ;;  %935 = vst [vmem:[%s250_s29] sm:$0xff] %v933_v2 }
 0x138   : > { %936 = vst [vmem:[%s250_s29 + $0x8] sm:$0xff] %v934_v3 }
 0x139 PF: > { %s13_s14 = sadd.s32 1, %s1139_s14   ;;  %s1578_s12 = smov %s1135_s13 }
 0x13a   : > { %p10_p5 = scmp.ge.s32.totalorder %s13_s14, 4   ;;  %s1579_s13 = smov %s1581_s15 }
 0x13c   :  { %12 = sbr.rel (!%p10_p5) target bundleno = 2 (0x2), region = 68 }

</bundles_post_ra>
